<compile_context>
chip_gen: v7x
topology: tpu7x:2x2x1
jax: 0.10.0
libtpu: 0.0.40
codegen_flags: <defaults>
</compile_context>

<pallas_src>
import jax
import jax.numpy as jnp
from jax.experimental import pallas as pl
from jax.experimental.pallas import tpu as pltpu


def _channel_independence_kernel(x_ref, o_ref):
    # x_ref: (TB, L, C) input block; o_ref: (TB, C, L) output block.
    # Pure data movement: swap the last two axes (per-batch XLU transpose).
    # Output last dim is L -> lane-dense stores.
    o_ref[...] = jnp.transpose(x_ref[...], (0, 2, 1))


def _round_up(x: int, m: int) -> int:
    return ((x + m - 1) // m) * m


def _sublane_multiple(dtype) -> int:
    # f32 tiles the second-to-last dim to 8 sublanes; sub-32-bit dtypes pack
    # along sublanes (bf16 -> 16, int8 -> 32).
    itemsize = jnp.dtype(dtype).itemsize
    return 8 * max(1, 4 // itemsize)


def _vmem_budgets() -> tuple[int, int]:
    """Returns (double_buffered_working_set_budget, vmem_limit_bytes)."""
    try:
        cap = pltpu.get_tpu_info().vmem_capacity_bytes
    except Exception:
        cap = 64 << 20  # conservative fallback (v7x per-TC physical VMEM)
    # Working-set budget: <= 12 MiB everywhere (v5e saturates its HBM BW well
    # below this); on v7x (64 MiB VMEM) this becomes 8 MiB.
    budget = min(12 << 20, cap // 8)
    # Scoped VMEM limit we explicitly claim from Mosaic (above v5e's 16 MiB default).
    vmem_limit = min(32 << 20, cap // 2)
    return int(budget), int(vmem_limit)


_MIN_GRID_STEPS = 4  # keep pipelining + both v7x TensorCores busy


def _choose_batch_tile(B: int, L: int, C: int, dtype, budget_bytes: int) -> int:
    itemsize = jnp.dtype(dtype).itemsize
    sub = _sublane_multiple(dtype)
    # Padded per-batch VMEM footprint of one input tile and one output tile.
    in_tile = _round_up(L, sub) * _round_up(max(C, 1), 128) * itemsize
    out_tile = _round_up(max(C, 1), sub) * _round_up(L, 128) * itemsize
    per_b = 2 * (in_tile + out_tile)  # x2 double buffering (input + output)
    tb = max(1, budget_bytes // per_b)
    # Cap so the grid has >= _MIN_GRID_STEPS steps (when B allows it).
    tb = min(tb, B, max(1, -(-B // _MIN_GRID_STEPS)))
    return int(tb)


def channel_independence(x: jax.Array) -> jax.Array:
    """x: [B, L, C] -> [B*C, L, 1] (matches ChannelIndependence.forward)."""
    B, L, C = x.shape
    budget, vmem_limit = _vmem_budgets()
    tb = _choose_batch_tile(B, L, C, x.dtype, budget)
    grid = (pl.cdiv(B, tb),)

    out_blc = pl.pallas_call(
        _channel_independence_kernel,
        out_shape=jax.ShapeDtypeStruct((B, C, L), x.dtype),
        grid=grid,
        # Full-extent L and C blocks -> the (8,128) BlockSpec constraint is
        # trivially satisfied for any C (e.g. C=7) and any dtype packing.
        in_specs=[pl.BlockSpec((tb, L, C), lambda b: (b, 0, 0))],
        out_specs=pl.BlockSpec((tb, C, L), lambda b: (b, 0, 0)),
        compiler_params=pltpu.CompilerParams(
            dimension_semantics=("parallel",),
            vmem_limit_bytes=vmem_limit,
        ),
    )(x)

    # Row-major [B, C, L] -> [B*C, L, 1] is a free metadata reshape.
    return out_blc.reshape(B * C, L, 1)


def _reference(x: jax.Array) -> jax.Array:
    _, L, _ = x.shape
    return jnp.transpose(x, (0, 2, 1)).reshape(-1, L, 1)


def _check(x: jax.Array) -> None:
    out = jax.block_until_ready(channel_independence(x))
    ref = _reference(x)
    B, L, C = x.shape
    assert out.shape == (B * C, L, 1), out.shape
    assert out.dtype == x.dtype, out.dtype
    assert jnp.array_equal(out, ref), f"mismatch vs reference for shape {x.shape}"


if __name__ == "__main__":
    key = jax.random.PRNGKey(0)
    k0, k1, k2, k3 = jax.random.split(key, 4)

    # Small shape consistent with the module's forward: [batch, input_len, num_features].
    _check(jax.random.normal(k0, (2, 16, 4), dtype=jnp.float32))

    # TimeDART-ish shape: odd channel count, L=336, multiple grid steps.
    _check(jax.random.normal(k1, (6, 336, 7), dtype=jnp.float32))

    # Ragged final batch block (B not divisible by the chosen batch tile).
    _check(jax.random.normal(k2, (5, 48, 3), dtype=jnp.float32))

    # Packed dtype (bf16) exercises the sublane-packing budget math.
    _check(jax.random.normal(k3, (4, 64, 5), dtype=jnp.bfloat16))

    print("KERNEL_OK")
</pallas_src>

<mosaic_0001>
module attributes {stable_mosaic.version = 11 : i64} {
  func.func @_channel_independence_kernel(%arg0: i32, %arg1: memref<1x16x4xf32, #tpu.memory_space<vmem>>, %arg2: memref<1x4x16xf32, #tpu.memory_space<vmem>>) attributes {dimension_semantics = [#tpu.dimension_semantics<parallel>], iteration_bounds = array<i64: 2>, scalar_prefetch = 0 : i64, scratch_operands = 0 : i64, tpu.core_type = #tpu.core_type<tc>, window_params = [{transform_indices = @transform_0, window_bounds = array<i64: 1, 16, 4>}, {transform_indices = @transform_1, window_bounds = array<i64: 1, 4, 16>}]} {
    %c0 = arith.constant 0 : index
    %c0_0 = arith.constant 0 : index
    %c0_1 = arith.constant 0 : index
    %0 = vector.load %arg1[%c0, %c0_0, %c0_1] : memref<1x16x4xf32, #tpu.memory_space<vmem>>, vector<1x16x4xf32>
    %1 = tpu.transpose %0, [0, 2, 1] : vector<1x16x4xf32> -> vector<1x4x16xf32>
    %c0_2 = arith.constant 0 : index
    %c0_3 = arith.constant 0 : index
    %c0_4 = arith.constant 0 : index
    %2 = vector.load %arg2[%c0_2, %c0_3, %c0_4] : memref<1x4x16xf32, #tpu.memory_space<vmem>>, vector<1x4x16xf32>
    tpu.vector_store %arg2[%c0_2, %c0_3, %c0_4], %1 {strides = array<i32>} : memref<1x4x16xf32, #tpu.memory_space<vmem>>, vector<1x4x16xf32>,
    return
  }
  func.func @transform_0(%arg0: i32) -> (i32, i32, i32) {
    %c0_i32 = arith.constant 0 : i32
    %c0_i32_0 = arith.constant 0 : i32
    %c0_i32_1 = arith.constant 0 : i32
    return %arg0, %c0_i32, %c0_i32_0 : i32, i32, i32
  }
  func.func @transform_1(%arg0: i32) -> (i32, i32, i32) {
    %c0_i32 = arith.constant 0 : i32
    %c0_i32_0 = arith.constant 0 : i32
    %c0_i32_1 = arith.constant 0 : i32
    return %arg0, %c0_i32, %c0_i32_0 : i32, i32, i32
  }
}

</mosaic_0001>

<bundles_post_ra>
// kernel: tpu_custom_call.1
= control target key start
LH: loop header
LB: loop body
LE: loop exit
PB: predicated region body
PF: predicated region fallthrough
CT: control target
= control target key end

     0   :  { %6 = vsyncpa [#allocation3], 0  ;;  %s451_s0 = inlined_call_operand.vmem [shape: f32[2,16,4], index: 0, kind: input, shape index: {}]   ;;  %s452_s1 = inlined_call_operand.hbm [shape: f32[2,4,16], index: 1, kind: output, shape index: {}]  }
   0x1   :  { %8 = vsyncpa [#allocation3 + $0x1], 0  ;;  %s351_s6 = smov 0   ;;  %s353_s7 = smov 0  }
   0x2   :  { %s355_s8 = smov 0   ;;  %s357_s9 = smov 0  }
   0x3 LB: > { %s372_s10 = sadd.s32 4294967295, %s338_s9   ;;  %s224_s11 = sadd.s32 4294967294, %s338_s9   ;;  %s338_s9 = sphi %s357_s9, %s458_s9   ;;  %s334_s8 = sphi %s355_s8, %s457_s8   ;;  %s330_s7 = sphi %s353_s7, %s456_s7   ;;  %s326_s6 = sphi %s351_s6, %s455_s6  }
   0x4   : > { %s376_s12 = sadd.s32 1, %s338_s9   ;;  %s47_s13 = sadd.s32 1, %s334_s8 }
   0x5   : > { %s44_s14 = ssub.s32 %s338_s9, %s376_s12  ;;  %p57_p0 = scmp.ne.s32.totalorder %s334_s8, %s330_s7 }
   0x6   : > { %p45_p1 = scmp.eq.s32.totalorder %s44_s14, 0  ;;  %p58_p2 = scmp.eq.s32.totalorder %s372_s10, 1 }
   0x7   : > { %p63_p3 = scmp.ne.s32.totalorder %s330_s7, %s326_s6  ;;  %p64_p4 = scmp.eq.s32.totalorder %s224_s11, 1 }
   0x8   : > { %s387_s15 = scalar_select %p45_p1, %s334_s8, %s47_s13  }
   0x9   : > { %p389_p5 = por %p58_p2, %p57_p0  ;;  %p393_p6 = por %p64_p4, %p63_p3 }
   0xa   : > { %p227_p7 = scmp.ge.s32.totalorder %s338_s9, 1  ;;  %p90_p8 = scmp.lt.s32.totalorder %s338_s9, 3 }
   0xc   : > { %p91_p9 = pnand %p227_p7, %p90_p8 }
   0xd   : > { %p110_p10 = scmp.lt.s32.totalorder (!%p91_p9), %s372_s10, 1  ;;  %s107_s23 = sand.u32 (!%p91_p9), 1, %s330_s7   ;;  %vm149_vm0 = vcmask (!%p91_p9), 125952  }
   0xe   : > { %94 = sbr.rel (%p91_p9) target bundleno = 169 (0xa9), region = 24  ;;  %s228_s24 = sshll.u32 (!%p91_p9), %s107_s23, 2 }
   0xf   : > { %s232_s25 = sshll.u32 (!%p91_p9), %s372_s10, 6  ;;  %s109_s26 = scalar_lea.vmem (!%p91_p9), [#allocation2], %s228_s24 }
  0x10   : > { %s165_s27 = sshll.u32 (!%p91_p9), %s109_s26, 4  ;;  %s409_s30 = scalar_lea.hbm (!%p91_p9), %s452_s1, %s232_s25  ;;  %s411_s27 = int_to_ptr.vmem [resolvable:$true] %s165_s27 }
  0x11   : > { %s152_s2 = scalar_lea.sflag (!%p91_p9), [#allocation3], %s107_s23  ;;  %s276_s3 = scalar_lea.vmem (!%p91_p9), %s411_s27, 64 }
  0x12   : > { %p277_p11 = scmp.ne.s32.totalorder (!%p91_p9), %s411_s27, %s276_s3  ;;  %s340_s4 = smov (!%p91_p9), [#allocation2]  }
  0x13   : > { %s280_s5 = sshll.u32 (!%p91_p9), %s340_s4, 4  ;;  %s281_s5 = int_to_ptr.vmem [resolvable:$false] %s280_s5 }
  0x14   : > { %p278_p12 = pnand (!%p91_p9), %p277_p11, %p389_p5  ;;  %p283_p0 = scmp.lt.s32.totalorder (!%p91_p9), %s411_s27, %s281_s5 }
  0x15   : > { %s111_s18 = scalar_select %p110_p10, %s372_s10, 1 }
  0x16   : > { %p279_p13 = pneg %p278_p12  ;;  %s282_s10 = scalar_lea.vmem %s281_s5, 128 }
  0x17   : > { %s235_s19 = sshll.u32 %s111_s18, 4  ;;  %p284_p1 = scmp.lt.s32.totalorder %s282_s10, %s276_s3 }
  0x18   : > { %s114_s22 = scalar_lea.vmem %s451_s0, %s235_s19 }
  0x19   : > { %v115_v0 = vld [vmem:[%s114_s22] sm:$0xff]  ;;  %v116_v1 = vld [vmem:[%s114_s22 + $0x8] sm:$0xff]  ;;  %p285_p2 = por %p284_p1, %p283_p0 }
  0x1a   : > { %117 = vxpose.xlu0.b32.start [1/2] (short) (narrow) %v115_v0, 8 }
  0x1b   : > { %p286_p3 = pnand %p285_p2, %p279_p13 }
  0x1e   : > { %118 = vxpose.xlu0.b32.end [2/2] (short) (narrow) %v116_v1, 8 }
  0x9a   : > { %v133_v2 = vpop.trf.xlu0 }
  0x9b   : > { %150 = vst.msk [vmem:[%s109_s26] sm:$0xf] %vm149_vm0, %v133_v2 }
  0x9c   : > { %289 = shalt.err (!%p286_p3)
}
  0x9d   : > { %s290_s11 = scalar_lea.hbm %s409_s30, 64  ;;  %s294_s18 = scalar_lea.hbm %s452_s1, 128 }
  0x9e   : > { %p291_p4 = scmp.ne.s32.totalorder %s409_s30, %s290_s11  ;;  %p295_p9 = scmp.lt.u32.totalorder %s409_s30, %s452_s1 }
  0x9f   : > { %p296_p10 = scmp.lt.u32.totalorder %s294_s18, %s290_s11  ;;  %p298_p12 = scmp.lt.u32.totalorder %s290_s11, %s409_s30 }
  0xa0   : > { %p292_p7 = pnand %p291_p4, %p389_p5 }
  0xa1   : > { %p297_p11 = por %p296_p10, %p295_p9 }
  0xa2   : > { %p293_p8 = pneg %p292_p7 }
  0xa3   : > { %p299_p13 = por %p298_p12, %p297_p11 }
  0xa5   : > { %p300_p0 = pnand %p299_p13, %p293_p8 }
  0xa7   : > { %303 = shalt.err (!%p300_p0)
}
  0xa8   : > { %236 = dma.vmem_to_hbm [thread:$0]  (%p389_p5), %s411_s27, 64, %s409_s30, %s152_s2  }
  0xa9 PF: > { %p242_p1 = scmp.ge.s32.totalorder %s338_s9, 2  ;;  %s177_s21 = sand.u32 1, %s326_s6  }
  0xaa   : > { %s178_s22 = scalar_lea.sflag [#allocation3], %s177_s21 }
  0xab   : > { %p239_p2 = pnand %p242_p1, %p393_p6 }
  0xad   : > { %321 = dma.done.wait (!%p239_p2), %s178_s22, 64  }
  0xae   : > { %323 = vsyncadd (!%p239_p2), %s178_s22, 4294967232  ;;  %p11_p3 = scmp.ge.s32.totalorder %s376_s12, 4   ;;  %s455_s6 = smov %s330_s7 }
  0xaf   : > { %s456_s7 = smov %s334_s8  ;;  %s457_s8 = smov %s387_s15 }
  0xb0   : > { %s458_s9 = smov %s376_s12  ;;  %13 = sbr.rel (!%p11_p3) target bundleno = 3 (0x3), region = 59 }
  0xb7   :  { %183 = vsyncpa [#allocation3], 1 }
  0xb8   :  { %185 = vsyncpa [#allocation3 + $0x1], 1 }

</bundles_post_ra>
